<compile_context>
chip_gen: v5e
topology: v5e:2x2
jax: 0.10.0
libtpu: 0.0.40
codegen_flags: <defaults>
</compile_context>

<pallas_src>
import functools

import jax
import jax.numpy as jnp
from jax.experimental import pallas as pl
from jax.experimental.pallas import tpu as pltpu


# ----------------------------------------------------------------------------
# Fused kernel: all-head projection + masked softmax attention + output proj.
# ----------------------------------------------------------------------------
def _mha_fused_kernel(q_ref, k_ref, v_ref, mask_ref,
                      wq_ref, wk_ref, wv_ref, pw_ref, pb_ref,
                      out_ref, attn_ref, *, n_head, d_k, d_v):
    f32 = jnp.float32
    q = q_ref[...]            # [tq, D]   (compute dtype, e.g. bf16)
    k = k_ref[...]            # [Lk, D]
    v = v_ref[...]            # [Lk, D]
    cdt = q.dtype

    # One big projection per operand for all heads (MXU-friendly: K = D,
    # N = H*d_k).  1/temper is already folded into wq.
    qh = jnp.dot(q, wq_ref[...], preferred_element_type=f32).astype(cdt)  # [tq, H*d_k]
    kh = jnp.dot(k, wk_ref[...], preferred_element_type=f32).astype(cdt)  # [Lk, H*d_k]
    vh = jnp.dot(v, wv_ref[...], preferred_element_type=f32).astype(cdt)  # [Lk, H*d_v]

    masked = mask_ref[...] > 0            # [tq, Lk], 1.0 == masked position
    neg = jnp.float32(-1e18)

    tq = q.shape[0]
    d_model = out_ref.shape[-1]
    acc = jnp.zeros((tq, d_model), dtype=f32)   # fused output-projection accumulator

    for h in range(n_head):               # static unroll over heads
        qh_h = qh[:, h * d_k:(h + 1) * d_k]          # [tq, d_k]
        kh_h = kh[:, h * d_k:(h + 1) * d_k]          # [Lk, d_k]
        vh_h = vh[:, h * d_v:(h + 1) * d_v]          # [Lk, d_v]

        # scaled scores (scale folded into wq) + masked_fill(-1e18)
        s = jnp.einsum('qd,kd->qk', qh_h, kh_h,
                       preferred_element_type=f32)   # [tq, Lk] f32
        s = jnp.where(masked, neg, s)

        # numerically-stable softmax over keys (== BottleSoftmax(dim=1))
        m = jnp.max(s, axis=-1, keepdims=True)
        e = jnp.exp(s - m)
        denom = jnp.sum(e, axis=-1, keepdims=True)
        attn = e * pl.reciprocal(denom, approx=True)

        attn_ref[h, :, :] = attn                     # head-major attention map

        # context for this head, then fused slice of the output projection:
        #   concat_h(ctx_h) @ W_proj^T  ==  sum_h ctx_h @ W_proj^T[h]
        ctx = jnp.dot(attn.astype(cdt), vh_h,
                      preferred_element_type=f32)    # [tq, d_v]
        acc = acc + jnp.dot(ctx.astype(cdt), pw_ref[h],
                            preferred_element_type=f32)   # [tq, D]

    out_ref[...] = (acc + pb_ref[...]).astype(out_ref.dtype)


def _mha_fused(q, k, v, mask_f, wq_c, wk_c, wv_c, pw3, pb2,
               *, n_head, d_k, d_v, tq):
    B, Lq, D = q.shape
    _, Lk, _ = k.shape
    n_qt = pl.cdiv(Lq, tq)

    kernel = functools.partial(_mha_fused_kernel,
                               n_head=n_head, d_k=d_k, d_v=d_v)

    out_shape = (
        jax.ShapeDtypeStruct((B, Lq, D), jnp.float32),            # projected outputs
        jax.ShapeDtypeStruct((n_head, B, Lq, Lk), jnp.float32),   # attention maps
    )

    grid_spec = pltpu.PrefetchScalarGridSpec(
        num_scalar_prefetch=0,
        # B outer, q-tile inner: k/v blocks (and all weights) are invariant on
        # the inner axis, so they stay VMEM-resident instead of re-DMA'ing.
        grid=(B, n_qt),
        in_specs=[
            pl.BlockSpec((None, tq, Lk if False else D), lambda b, i: (b, i, 0)),  # q
            pl.BlockSpec((None, Lk, D), lambda b, i: (b, 0, 0)),                   # k
            pl.BlockSpec((None, Lk, D), lambda b, i: (b, 0, 0)),                   # v
            pl.BlockSpec((None, tq, Lk), lambda b, i: (b, i, 0)),                  # mask
            pl.BlockSpec((D, n_head * d_k), lambda b, i: (0, 0)),                  # W_q (packed, /temper)
            pl.BlockSpec((D, n_head * d_k), lambda b, i: (0, 0)),                  # W_k (packed)
            pl.BlockSpec((D, n_head * d_v), lambda b, i: (0, 0)),                  # W_v (packed)
            pl.BlockSpec((n_head, d_v, D), lambda b, i: (0, 0, 0)),                # W_proj^T per head
            pl.BlockSpec((1, D), lambda b, i: (0, 0)),                             # proj bias
        ],
        out_specs=[
            pl.BlockSpec((None, tq, D), lambda b, i: (b, i, 0)),                   # [B, Lq, D]
            pl.BlockSpec((n_head, None, tq, Lk), lambda b, i: (0, b, i, 0)),       # [H, B, Lq, Lk]
        ],
    )

    return pl.pallas_call(
        kernel,
        out_shape=out_shape,
        grid_spec=grid_spec,
        compiler_params=pltpu.CompilerParams(
            dimension_semantics=("parallel", "parallel")),
    )(q, k, v, mask_f, wq_c, wk_c, wv_c, pw3, pb2)


# ----------------------------------------------------------------------------
# Full MultiHeadAttention forward
# ----------------------------------------------------------------------------
def multi_head_attention(q, k, v, mask, params, *, compute_dtype=jnp.bfloat16):
    """
    q, k, v : [B, L, D] float32
    mask    : [B, Lq, Lk] bool (True = masked -> filled with -1e18)
    returns (outputs [B, Lq, D] f32, attns [n_head*B, Lq, Lk] f32)
    """
    w_qs, w_ks, w_vs, proj_w, proj_b = (
        params["w_qs"], params["w_ks"], params["w_vs"],
        params["proj_w"], params["proj_b"])

    B, Lq, D = q.shape
    _, Lk, _ = k.shape
    H, _, d_k = w_qs.shape
    d_v = w_vs.shape[-1]
    temper = float(D) ** 0.5          # sqrt(model_dim), matching the module

    # One-time wrapper-side weight transforms.
    def _pack(w):                     # [H, D, dh] -> [D, H*dh], head h at cols h*dh:(h+1)*dh
        Hh, Dd, dh = w.shape
        return jnp.transpose(w, (1, 0, 2)).reshape(Dd, Hh * dh)

    wq_c = (_pack(w_qs) * (1.0 / temper)).astype(compute_dtype)   # fold 1/temper into W_q
    wk_c = _pack(w_ks).astype(compute_dtype)
    wv_c = _pack(w_vs).astype(compute_dtype)
    pw3 = proj_w.T.reshape(H, d_v, D).astype(compute_dtype)       # pre-transposed nn.Linear weight
    pb2 = proj_b.reshape(1, D).astype(jnp.float32)

    mask_f = mask.astype(jnp.float32)

    tq = Lq if Lq <= 128 else 128

    out, attn_h = _mha_fused(
        q.astype(compute_dtype), k.astype(compute_dtype), v.astype(compute_dtype),
        mask_f, wq_c, wk_c, wv_c, pw3, pb2,
        n_head=H, d_k=d_k, d_v=d_v, tq=tq)

    # attns already head-major [H, B, Lq, Lk]; reshape to torch's [H*B, Lq, Lk] is free.
    attns = attn_h.reshape(H * B, Lq, Lk)
    return out, attns


# ----------------------------------------------------------------------------
# Deterministic parameter init (orthogonal-ish; shapes match the module)
# ----------------------------------------------------------------------------
def init_params(key, head_count, model_dim):
    d_k = d_v = model_dim // head_count
    k1, k2, k3, k4, k5 = jax.random.split(key, 5)
    orth = jax.nn.initializers.orthogonal()
    w_qs = orth(k1, (head_count, model_dim, d_k), jnp.float32)
    w_ks = orth(k2, (head_count, model_dim, d_k), jnp.float32)
    w_vs = orth(k3, (head_count, model_dim, d_v), jnp.float32)
    proj_w = orth(k4, (model_dim, head_count * d_v), jnp.float32)
    proj_b = jax.random.normal(k5, (model_dim,), jnp.float32) * 0.01
    return dict(w_qs=w_qs, w_ks=w_ks, w_vs=w_vs, proj_w=proj_w, proj_b=proj_b)


if __name__ == "__main__":
    B, L, D, H = 2, 8, 32, 4

    key = jax.random.PRNGKey(0)
    kq, kk, kv, km, kp = jax.random.split(key, 5)

    q = jax.random.normal(kq, (B, L, D), jnp.float32)
    k = jax.random.normal(kk, (B, L, D), jnp.float32)
    v = jax.random.normal(kv, (B, L, D), jnp.float32)
    # boolean attention mask, True = masked (masked_fill with -1e18)
    mask = jax.random.uniform(km, (B, L, L)) < 0.2

    params = init_params(kp, H, D)

    outputs, attns = multi_head_attention(q, k, v, mask, params)
    jax.block_until_ready((outputs, attns))

    assert outputs.shape == (B, L, D)
    assert attns.shape == (H * B, L, L)
    assert bool(jnp.all(jnp.isfinite(outputs)))
    assert bool(jnp.all(jnp.isfinite(attns)))
    print("KERNEL_OK")
</pallas_src>

<mosaic_0001>
module attributes {stable_mosaic.version = 11 : i64} {
  func.func @_mha_fused_kernel(%arg0: i32, %arg1: i32, %arg2: memref<1x8x32xbf16, #tpu.memory_space<vmem>>, %arg3: memref<1x8x32xbf16, #tpu.memory_space<vmem>>, %arg4: memref<1x8x32xbf16, #tpu.memory_space<vmem>>, %arg5: memref<1x8x8xf32, #tpu.memory_space<vmem>>, %arg6: memref<32x32xbf16, #tpu.memory_space<vmem>>, %arg7: memref<32x32xbf16, #tpu.memory_space<vmem>>, %arg8: memref<32x32xbf16, #tpu.memory_space<vmem>>, %arg9: memref<4x8x32xbf16, #tpu.memory_space<vmem>>, %arg10: memref<1x32xf32, #tpu.memory_space<vmem>>, %arg11: memref<1x8x32xf32, #tpu.memory_space<vmem>>, %arg12: memref<4x1x8x8xf32, #tpu.memory_space<vmem>>) attributes {dimension_semantics = [#tpu.dimension_semantics<parallel>, #tpu.dimension_semantics<parallel>], iteration_bounds = array<i64: 2, 1>, scalar_prefetch = 0 : i64, scratch_operands = 0 : i64, tpu.core_type = #tpu.core_type<tc>, window_params = [{transform_indices = @transform_0, window_bounds = array<i64: 1, 8, 32>}, {transform_indices = @transform_1, window_bounds = array<i64: 1, 8, 32>}, {transform_indices = @transform_2, window_bounds = array<i64: 1, 8, 32>}, {transform_indices = @transform_3, window_bounds = array<i64: 1, 8, 8>}, {pipeline_mode = #tpu.pipeline_mode<synchronous>, transform_indices = @transform_4, window_bounds = array<i64: 32, 32>}, {pipeline_mode = #tpu.pipeline_mode<synchronous>, transform_indices = @transform_5, window_bounds = array<i64: 32, 32>}, {pipeline_mode = #tpu.pipeline_mode<synchronous>, transform_indices = @transform_6, window_bounds = array<i64: 32, 32>}, {pipeline_mode = #tpu.pipeline_mode<synchronous>, transform_indices = @transform_7, window_bounds = array<i64: 4, 8, 32>}, {pipeline_mode = #tpu.pipeline_mode<synchronous>, transform_indices = @transform_8, window_bounds = array<i64: 1, 32>}, {transform_indices = @transform_9, window_bounds = array<i64: 1, 8, 32>}, {transform_indices = @transform_10, window_bounds = array<i64: 4, 1, 8, 8>}]} {
    %c0 = arith.constant 0 : index
    %c0_0 = arith.constant 0 : index
    %c0_1 = arith.constant 0 : index
    %0 = vector.load %arg2[%c0, %c0_0, %c0_1] : memref<1x8x32xbf16, #tpu.memory_space<vmem>>, vector<1x8x32xbf16>
    %1 = vector.shape_cast %0 : vector<1x8x32xbf16> to vector<8x32xbf16>
    %c0_2 = arith.constant 0 : index
    %c0_3 = arith.constant 0 : index
    %c0_4 = arith.constant 0 : index
    %2 = vector.load %arg3[%c0_2, %c0_3, %c0_4] : memref<1x8x32xbf16, #tpu.memory_space<vmem>>, vector<1x8x32xbf16>
    %3 = vector.shape_cast %2 : vector<1x8x32xbf16> to vector<8x32xbf16>
    %c0_5 = arith.constant 0 : index
    %c0_6 = arith.constant 0 : index
    %c0_7 = arith.constant 0 : index
    %4 = vector.load %arg4[%c0_5, %c0_6, %c0_7] : memref<1x8x32xbf16, #tpu.memory_space<vmem>>, vector<1x8x32xbf16>
    %5 = vector.shape_cast %4 : vector<1x8x32xbf16> to vector<8x32xbf16>
    %c0_8 = arith.constant 0 : index
    %c0_9 = arith.constant 0 : index
    %6 = vector.load %arg6[%c0_8, %c0_9] : memref<32x32xbf16, #tpu.memory_space<vmem>>, vector<32x32xbf16>
    %cst = arith.constant dense<0.000000e+00> : vector<8x32xf32>
    %7 = tpu.matmul %1, %6, %cst {dimension_numbers = #tpu.dot_dimension_numbers<[1], [0], [0], [1], [0, 0, 1, 1], [], []>} : vector<8x32xbf16>, vector<32x32xbf16>, vector<8x32xf32> -> vector<8x32xf32>
    %8 = arith.truncf %7 : vector<8x32xf32> to vector<8x32xbf16>
    %c0_10 = arith.constant 0 : index
    %c0_11 = arith.constant 0 : index
    %9 = vector.load %arg7[%c0_10, %c0_11] : memref<32x32xbf16, #tpu.memory_space<vmem>>, vector<32x32xbf16>
    %cst_12 = arith.constant dense<0.000000e+00> : vector<8x32xf32>
    %10 = tpu.matmul %3, %9, %cst_12 {dimension_numbers = #tpu.dot_dimension_numbers<[1], [0], [0], [1], [0, 0, 1, 1], [], []>} : vector<8x32xbf16>, vector<32x32xbf16>, vector<8x32xf32> -> vector<8x32xf32>
    %11 = arith.truncf %10 : vector<8x32xf32> to vector<8x32xbf16>
    %c0_13 = arith.constant 0 : index
    %c0_14 = arith.constant 0 : index
    %12 = vector.load %arg8[%c0_13, %c0_14] : memref<32x32xbf16, #tpu.memory_space<vmem>>, vector<32x32xbf16>
    %cst_15 = arith.constant dense<0.000000e+00> : vector<8x32xf32>
    %13 = tpu.matmul %5, %12, %cst_15 {dimension_numbers = #tpu.dot_dimension_numbers<[1], [0], [0], [1], [0, 0, 1, 1], [], []>} : vector<8x32xbf16>, vector<32x32xbf16>, vector<8x32xf32> -> vector<8x32xf32>
    %14 = arith.truncf %13 : vector<8x32xf32> to vector<8x32xbf16>
    %c0_16 = arith.constant 0 : index
    %c0_17 = arith.constant 0 : index
    %c0_18 = arith.constant 0 : index
    %15 = vector.load %arg5[%c0_16, %c0_17, %c0_18] : memref<1x8x8xf32, #tpu.memory_space<vmem>>, vector<1x8x8xf32>
    %16 = vector.shape_cast %15 : vector<1x8x8xf32> to vector<8x8xf32>
    %cst_19 = arith.constant 0.000000e+00 : f32
    %17 = vector.broadcast %cst_19 : f32 to vector<8x8xf32>
    %18 = arith.cmpf ogt, %16, %17 : vector<8x8xf32>
    %cst_20 = arith.constant 0.000000e+00 : f32
    %19 = vector.broadcast %cst_20 : f32 to vector<8x32xf32>
    %20 = vector.extract_strided_slice %8 {offsets = [0, 0], sizes = [8, 8], strides = [1, 1]} : vector<8x32xbf16> to vector<8x8xbf16>
    %21 = vector.extract_strided_slice %11 {offsets = [0, 0], sizes = [8, 8], strides = [1, 1]} : vector<8x32xbf16> to vector<8x8xbf16>
    %22 = vector.extract_strided_slice %14 {offsets = [0, 0], sizes = [8, 8], strides = [1, 1]} : vector<8x32xbf16> to vector<8x8xbf16>
    "tpu.trace_start"() <{level = 10 : i32, message = "qd,kd->qk"}> : () -> ()
    %cst_21 = arith.constant dense<0.000000e+00> : vector<8x8xf32>
    %23 = tpu.matmul %20, %21, %cst_21 {dimension_numbers = #tpu.dot_dimension_numbers<[1], [1], [0], [0], [0, 0, 1, 0], [], []>} : vector<8x8xbf16>, vector<8x8xbf16>, vector<8x8xf32> -> vector<8x8xf32>
    %cst_22 = arith.constant -9.99999984E+17 : f32
    "tpu.trace_stop"() : () -> ()
    %24 = vector.broadcast %cst_22 : f32 to vector<8x8xf32>
    %25 = arith.select %18, %24, %23 : vector<8x8xi1>, vector<8x8xf32>
    %cst_23 = arith.constant dense<0xFF800000> : vector<8xf32>
    %26 = vector.multi_reduction <maximumf>, %25, %cst_23 [1] : vector<8x8xf32> to vector<8xf32>
    %27 = vector.shape_cast %26 : vector<8xf32> to vector<8x1xf32>
    %28 = vector.broadcast %27 : vector<8x1xf32> to vector<8x8xf32>
    %29 = arith.subf %25, %28 : vector<8x8xf32>
    %30 = math.exp %29 : vector<8x8xf32>
    %cst_24 = arith.constant dense<0.000000e+00> : vector<8xf32>
    %31 = vector.multi_reduction <add>, %30, %cst_24 [1] : vector<8x8xf32> to vector<8xf32>
    %32 = vector.shape_cast %31 : vector<8xf32> to vector<8x1xf32>
    %33 = tpu.reciprocal %32 {approx = true} : vector<8x1xf32> -> vector<8x1xf32>
    %34 = vector.broadcast %33 : vector<8x1xf32> to vector<8x8xf32>
    %35 = arith.mulf %30, %34 : vector<8x8xf32>
    %c0_25 = arith.constant 0 : index
    %c0_26 = arith.constant 0 : index
    %c0_27 = arith.constant 0 : index
    %c0_28 = arith.constant 0 : index
    %36 = vector.load %arg12[%c0_25, %c0_26, %c0_27, %c0_28] : memref<4x1x8x8xf32, #tpu.memory_space<vmem>>, vector<1x1x8x8xf32>
    %37 = vector.shape_cast %36 : vector<1x1x8x8xf32> to vector<8x8xf32>
    %38 = vector.shape_cast %35 : vector<8x8xf32> to vector<1x1x8x8xf32>
    tpu.vector_store %arg12[%c0_25, %c0_26, %c0_27, %c0_28], %38 {strides = array<i32>} : memref<4x1x8x8xf32, #tpu.memory_space<vmem>>, vector<1x1x8x8xf32>,
    %39 = arith.truncf %35 : vector<8x8xf32> to vector<8x8xbf16>
    %cst_29 = arith.constant dense<0.000000e+00> : vector<8x8xf32>
    %40 = tpu.matmul %39, %22, %cst_29 {dimension_numbers = #tpu.dot_dimension_numbers<[1], [0], [0], [1], [0, 0, 1, 1], [], []>} : vector<8x8xbf16>, vector<8x8xbf16>, vector<8x8xf32> -> vector<8x8xf32>
    %41 = arith.truncf %40 : vector<8x8xf32> to vector<8x8xbf16>
    %c0_30 = arith.constant 0 : index
    %c0_31 = arith.constant 0 : index
    %c0_32 = arith.constant 0 : index
    %42 = vector.load %arg9[%c0_30, %c0_31, %c0_32] : memref<4x8x32xbf16, #tpu.memory_space<vmem>>, vector<1x8x32xbf16>
    %43 = vector.shape_cast %42 : vector<1x8x32xbf16> to vector<8x32xbf16>
    %cst_33 = arith.constant dense<0.000000e+00> : vector<8x32xf32>
    %44 = tpu.matmul %41, %43, %cst_33 {dimension_numbers = #tpu.dot_dimension_numbers<[1], [0], [0], [1], [0, 0, 1, 1], [], []>} : vector<8x8xbf16>, vector<8x32xbf16>, vector<8x32xf32> -> vector<8x32xf32>
    %45 = arith.addf %19, %44 : vector<8x32xf32>
    %46 = vector.extract_strided_slice %8 {offsets = [0, 8], sizes = [8, 8], strides = [1, 1]} : vector<8x32xbf16> to vector<8x8xbf16>
    %47 = vector.extract_strided_slice %11 {offsets = [0, 8], sizes = [8, 8], strides = [1, 1]} : vector<8x32xbf16> to vector<8x8xbf16>
    %48 = vector.extract_strided_slice %14 {offsets = [0, 8], sizes = [8, 8], strides = [1, 1]} : vector<8x32xbf16> to vector<8x8xbf16>
    "tpu.trace_start"() <{level = 10 : i32, message = "qd,kd->qk"}> : () -> ()
    %cst_34 = arith.constant dense<0.000000e+00> : vector<8x8xf32>
    %49 = tpu.matmul %46, %47, %cst_34 {dimension_numbers = #tpu.dot_dimension_numbers<[1], [1], [0], [0], [0, 0, 1, 0], [], []>} : vector<8x8xbf16>, vector<8x8xbf16>, vector<8x8xf32> -> vector<8x8xf32>
    %cst_35 = arith.constant -9.99999984E+17 : f32
    "tpu.trace_stop"() : () -> ()
    %50 = vector.broadcast %cst_35 : f32 to vector<8x8xf32>
    %51 = arith.select %18, %50, %49 : vector<8x8xi1>, vector<8x8xf32>
    %cst_36 = arith.constant dense<0xFF800000> : vector<8xf32>
    %52 = vector.multi_reduction <maximumf>, %51, %cst_36 [1] : vector<8x8xf32> to vector<8xf32>
    %53 = vector.shape_cast %52 : vector<8xf32> to vector<8x1xf32>
    %54 = vector.broadcast %53 : vector<8x1xf32> to vector<8x8xf32>
    %55 = arith.subf %51, %54 : vector<8x8xf32>
    %56 = math.exp %55 : vector<8x8xf32>
    %cst_37 = arith.constant dense<0.000000e+00> : vector<8xf32>
    %57 = vector.multi_reduction <add>, %56, %cst_37 [1] : vector<8x8xf32> to vector<8xf32>
    %58 = vector.shape_cast %57 : vector<8xf32> to vector<8x1xf32>
    %59 = tpu.reciprocal %58 {approx = true} : vector<8x1xf32> -> vector<8x1xf32>
    %60 = vector.broadcast %59 : vector<8x1xf32> to vector<8x8xf32>
    %61 = arith.mulf %56, %60 : vector<8x8xf32>
    %c1 = arith.constant 1 : index
    %c0_38 = arith.constant 0 : index
    %c0_39 = arith.constant 0 : index
    %c0_40 = arith.constant 0 : index
    %62 = vector.load %arg12[%c1, %c0_38, %c0_39, %c0_40] : memref<4x1x8x8xf32, #tpu.memory_space<vmem>>, vector<1x1x8x8xf32>
    %63 = vector.shape_cast %62 : vector<1x1x8x8xf32> to vector<8x8xf32>
    %64 = vector.shape_cast %61 : vector<8x8xf32> to vector<1x1x8x8xf32>
    tpu.vector_store %arg12[%c1, %c0_38, %c0_39, %c0_40], %64 {strides = array<i32>} : memref<4x1x8x8xf32, #tpu.memory_space<vmem>>, vector<1x1x8x8xf32>,
    %65 = arith.truncf %61 : vector<8x8xf32> to vector<8x8xbf16>
    %cst_41 = arith.constant dense<0.000000e+00> : vector<8x8xf32>
    %66 = tpu.matmul %65, %48, %cst_41 {dimension_numbers = #tpu.dot_dimension_numbers<[1], [0], [0], [1], [0, 0, 1, 1], [], []>} : vector<8x8xbf16>, vector<8x8xbf16>, vector<8x8xf32> -> vector<8x8xf32>
    %67 = arith.truncf %66 : vector<8x8xf32> to vector<8x8xbf16>
    %c1_42 = arith.constant 1 : index
    %c0_43 = arith.constant 0 : index
    %c0_44 = arith.constant 0 : index
    %68 = vector.load %arg9[%c1_42, %c0_43, %c0_44] : memref<4x8x32xbf16, #tpu.memory_space<vmem>>, vector<1x8x32xbf16>
    %69 = vector.shape_cast %68 : vector<1x8x32xbf16> to vector<8x32xbf16>
    %cst_45 = arith.constant dense<0.000000e+00> : vector<8x32xf32>
    %70 = tpu.matmul %67, %69, %cst_45 {dimension_numbers = #tpu.dot_dimension_numbers<[1], [0], [0], [1], [0, 0, 1, 1], [], []>} : vector<8x8xbf16>, vector<8x32xbf16>, vector<8x32xf32> -> vector<8x32xf32>
    %71 = arith.addf %45, %70 : vector<8x32xf32>
    %72 = vector.extract_strided_slice %8 {offsets = [0, 16], sizes = [8, 8], strides = [1, 1]} : vector<8x32xbf16> to vector<8x8xbf16>
    %73 = vector.extract_strided_slice %11 {offsets = [0, 16], sizes = [8, 8], strides = [1, 1]} : vector<8x32xbf16> to vector<8x8xbf16>
    %74 = vector.extract_strided_slice %14 {offsets = [0, 16], sizes = [8, 8], strides = [1, 1]} : vector<8x32xbf16> to vector<8x8xbf16>
    "tpu.trace_start"() <{level = 10 : i32, message = "qd,kd->qk"}> : () -> ()
    %cst_46 = arith.constant dense<0.000000e+00> : vector<8x8xf32>
    %75 = tpu.matmul %72, %73, %cst_46 {dimension_numbers = #tpu.dot_dimension_numbers<[1], [1], [0], [0], [0, 0, 1, 0], [], []>} : vector<8x8xbf16>, vector<8x8xbf16>, vector<8x8xf32> -> vector<8x8xf32>
    %cst_47 = arith.constant -9.99999984E+17 : f32
    "tpu.trace_stop"() : () -> ()
    %76 = vector.broadcast %cst_47 : f32 to vector<8x8xf32>
    %77 = arith.select %18, %76, %75 : vector<8x8xi1>, vector<8x8xf32>
    %cst_48 = arith.constant dense<0xFF800000> : vector<8xf32>
    %78 = vector.multi_reduction <maximumf>, %77, %cst_48 [1] : vector<8x8xf32> to vector<8xf32>
    %79 = vector.shape_cast %78 : vector<8xf32> to vector<8x1xf32>
    %80 = vector.broadcast %79 : vector<8x1xf32> to vector<8x8xf32>
    %81 = arith.subf %77, %80 : vector<8x8xf32>
    %82 = math.exp %81 : vector<8x8xf32>
    %cst_49 = arith.constant dense<0.000000e+00> : vector<8xf32>
    %83 = vector.multi_reduction <add>, %82, %cst_49 [1] : vector<8x8xf32> to vector<8xf32>
    %84 = vector.shape_cast %83 : vector<8xf32> to vector<8x1xf32>
    %85 = tpu.reciprocal %84 {approx = true} : vector<8x1xf32> -> vector<8x1xf32>
    %86 = vector.broadcast %85 : vector<8x1xf32> to vector<8x8xf32>
    %87 = arith.mulf %82, %86 : vector<8x8xf32>
    %c2 = arith.constant 2 : index
    %c0_50 = arith.constant 0 : index
    %c0_51 = arith.constant 0 : index
    %c0_52 = arith.constant 0 : index
    %88 = vector.load %arg12[%c2, %c0_50, %c0_51, %c0_52] : memref<4x1x8x8xf32, #tpu.memory_space<vmem>>, vector<1x1x8x8xf32>
    %89 = vector.shape_cast %88 : vector<1x1x8x8xf32> to vector<8x8xf32>
    %90 = vector.shape_cast %87 : vector<8x8xf32> to vector<1x1x8x8xf32>
    tpu.vector_store %arg12[%c2, %c0_50, %c0_51, %c0_52], %90 {strides = array<i32>} : memref<4x1x8x8xf32, #tpu.memory_space<vmem>>, vector<1x1x8x8xf32>,
    %91 = arith.truncf %87 : vector<8x8xf32> to vector<8x8xbf16>
    %cst_53 = arith.constant dense<0.000000e+00> : vector<8x8xf32>
    %92 = tpu.matmul %91, %74, %cst_53 {dimension_numbers = #tpu.dot_dimension_numbers<[1], [0], [0], [1], [0, 0, 1, 1], [], []>} : vector<8x8xbf16>, vector<8x8xbf16>, vector<8x8xf32> -> vector<8x8xf32>
    %93 = arith.truncf %92 : vector<8x8xf32> to vector<8x8xbf16>
    %c2_54 = arith.constant 2 : index
    %c0_55 = arith.constant 0 : index
    %c0_56 = arith.constant 0 : index
    %94 = vector.load %arg9[%c2_54, %c0_55, %c0_56] : memref<4x8x32xbf16, #tpu.memory_space<vmem>>, vector<1x8x32xbf16>
    %95 = vector.shape_cast %94 : vector<1x8x32xbf16> to vector<8x32xbf16>
    %cst_57 = arith.constant dense<0.000000e+00> : vector<8x32xf32>
    %96 = tpu.matmul %93, %95, %cst_57 {dimension_numbers = #tpu.dot_dimension_numbers<[1], [0], [0], [1], [0, 0, 1, 1], [], []>} : vector<8x8xbf16>, vector<8x32xbf16>, vector<8x32xf32> -> vector<8x32xf32>
    %97 = arith.addf %71, %96 : vector<8x32xf32>
    %98 = vector.extract_strided_slice %8 {offsets = [0, 24], sizes = [8, 8], strides = [1, 1]} : vector<8x32xbf16> to vector<8x8xbf16>
    %99 = vector.extract_strided_slice %11 {offsets = [0, 24], sizes = [8, 8], strides = [1, 1]} : vector<8x32xbf16> to vector<8x8xbf16>
    %100 = vector.extract_strided_slice %14 {offsets = [0, 24], sizes = [8, 8], strides = [1, 1]} : vector<8x32xbf16> to vector<8x8xbf16>
    "tpu.trace_start"() <{level = 10 : i32, message = "qd,kd->qk"}> : () -> ()
    %cst_58 = arith.constant dense<0.000000e+00> : vector<8x8xf32>
    %101 = tpu.matmul %98, %99, %cst_58 {dimension_numbers = #tpu.dot_dimension_numbers<[1], [1], [0], [0], [0, 0, 1, 0], [], []>} : vector<8x8xbf16>, vector<8x8xbf16>, vector<8x8xf32> -> vector<8x8xf32>
    %cst_59 = arith.constant -9.99999984E+17 : f32
    "tpu.trace_stop"() : () -> ()
    %102 = vector.broadcast %cst_59 : f32 to vector<8x8xf32>
    %103 = arith.select %18, %102, %101 : vector<8x8xi1>, vector<8x8xf32>
    %cst_60 = arith.constant dense<0xFF800000> : vector<8xf32>
    %104 = vector.multi_reduction <maximumf>, %103, %cst_60 [1] : vector<8x8xf32> to vector<8xf32>
    %105 = vector.shape_cast %104 : vector<8xf32> to vector<8x1xf32>
    %106 = vector.broadcast %105 : vector<8x1xf32> to vector<8x8xf32>
    %107 = arith.subf %103, %106 : vector<8x8xf32>
    %108 = math.exp %107 : vector<8x8xf32>
    %cst_61 = arith.constant dense<0.000000e+00> : vector<8xf32>
    %109 = vector.multi_reduction <add>, %108, %cst_61 [1] : vector<8x8xf32> to vector<8xf32>
    %110 = vector.shape_cast %109 : vector<8xf32> to vector<8x1xf32>
    %111 = tpu.reciprocal %110 {approx = true} : vector<8x1xf32> -> vector<8x1xf32>
    %112 = vector.broadcast %111 : vector<8x1xf32> to vector<8x8xf32>
    %113 = arith.mulf %108, %112 : vector<8x8xf32>
    %c3 = arith.constant 3 : index
    %c0_62 = arith.constant 0 : index
    %c0_63 = arith.constant 0 : index
    %c0_64 = arith.constant 0 : index
    %114 = vector.load %arg12[%c3, %c0_62, %c0_63, %c0_64] : memref<4x1x8x8xf32, #tpu.memory_space<vmem>>, vector<1x1x8x8xf32>
    %115 = vector.shape_cast %114 : vector<1x1x8x8xf32> to vector<8x8xf32>
    %116 = vector.shape_cast %113 : vector<8x8xf32> to vector<1x1x8x8xf32>
    tpu.vector_store %arg12[%c3, %c0_62, %c0_63, %c0_64], %116 {strides = array<i32>} : memref<4x1x8x8xf32, #tpu.memory_space<vmem>>, vector<1x1x8x8xf32>,
    %117 = arith.truncf %113 : vector<8x8xf32> to vector<8x8xbf16>
    %cst_65 = arith.constant dense<0.000000e+00> : vector<8x8xf32>
    %118 = tpu.matmul %117, %100, %cst_65 {dimension_numbers = #tpu.dot_dimension_numbers<[1], [0], [0], [1], [0, 0, 1, 1], [], []>} : vector<8x8xbf16>, vector<8x8xbf16>, vector<8x8xf32> -> vector<8x8xf32>
    %119 = arith.truncf %118 : vector<8x8xf32> to vector<8x8xbf16>
    %c3_66 = arith.constant 3 : index
    %c0_67 = arith.constant 0 : index
    %c0_68 = arith.constant 0 : index
    %120 = vector.load %arg9[%c3_66, %c0_67, %c0_68] : memref<4x8x32xbf16, #tpu.memory_space<vmem>>, vector<1x8x32xbf16>
    %121 = vector.shape_cast %120 : vector<1x8x32xbf16> to vector<8x32xbf16>
    %cst_69 = arith.constant dense<0.000000e+00> : vector<8x32xf32>
    %122 = tpu.matmul %119, %121, %cst_69 {dimension_numbers = #tpu.dot_dimension_numbers<[1], [0], [0], [1], [0, 0, 1, 1], [], []>} : vector<8x8xbf16>, vector<8x32xbf16>, vector<8x32xf32> -> vector<8x32xf32>
    %123 = arith.addf %97, %122 : vector<8x32xf32>
    %c0_70 = arith.constant 0 : index
    %c0_71 = arith.constant 0 : index
    %124 = vector.load %arg10[%c0_70, %c0_71] : memref<1x32xf32, #tpu.memory_space<vmem>>, vector<1x32xf32>
    %125 = vector.broadcast %124 : vector<1x32xf32> to vector<8x32xf32>
    %126 = arith.addf %123, %125 : vector<8x32xf32>
    %c0_72 = arith.constant 0 : index
    %c0_73 = arith.constant 0 : index
    %c0_74 = arith.constant 0 : index
    %127 = vector.load %arg11[%c0_72, %c0_73, %c0_74] : memref<1x8x32xf32, #tpu.memory_space<vmem>>, vector<1x8x32xf32>
    %128 = vector.shape_cast %127 : vector<1x8x32xf32> to vector<8x32xf32>
    %129 = vector.shape_cast %126 : vector<8x32xf32> to vector<1x8x32xf32>
    tpu.vector_store %arg11[%c0_72, %c0_73, %c0_74], %129 {strides = array<i32>} : memref<1x8x32xf32, #tpu.memory_space<vmem>>, vector<1x8x32xf32>,
    return
  }
  func.func @transform_0(%arg0: i32, %arg1: i32) -> (i32, i32, i32) {
    %c0_i32 = arith.constant 0 : i32
    %c0_i32_0 = arith.constant 0 : i32
    return %arg0, %arg1, %c0_i32 : i32, i32, i32
  }
  func.func @transform_1(%arg0: i32, %arg1: i32) -> (i32, i32, i32) {
    %c0_i32 = arith.constant 0 : i32
    %c0_i32_0 = arith.constant 0 : i32
    %c0_i32_1 = arith.constant 0 : i32
    return %arg0, %c0_i32, %c0_i32_0 : i32, i32, i32
  }
  func.func @transform_2(%arg0: i32, %arg1: i32) -> (i32, i32, i32) {
    %c0_i32 = arith.constant 0 : i32
    %c0_i32_0 = arith.constant 0 : i32
    %c0_i32_1 = arith.constant 0 : i32
    return %arg0, %c0_i32, %c0_i32_0 : i32, i32, i32
  }
  func.func @transform_3(%arg0: i32, %arg1: i32) -> (i32, i32, i32) {
    %c0_i32 = arith.constant 0 : i32
    %c0_i32_0 = arith.constant 0 : i32
    return %arg0, %arg1, %c0_i32 : i32, i32, i32
  }
  func.func @transform_4(%arg0: i32, %arg1: i32) -> (i32, i32) {
    %c0_i32 = arith.constant 0 : i32
    %c0_i32_0 = arith.constant 0 : i32
    %c0_i32_1 = arith.constant 0 : i32
    return %c0_i32, %c0_i32_0 : i32, i32
  }
  func.func @transform_5(%arg0: i32, %arg1: i32) -> (i32, i32) {
    %c0_i32 = arith.constant 0 : i32
    %c0_i32_0 = arith.constant 0 : i32
    %c0_i32_1 = arith.constant 0 : i32
    return %c0_i32, %c0_i32_0 : i32, i32
  }
  func.func @transform_6(%arg0: i32, %arg1: i32) -> (i32, i32) {
    %c0_i32 = arith.constant 0 : i32
    %c0_i32_0 = arith.constant 0 : i32
    %c0_i32_1 = arith.constant 0 : i32
    return %c0_i32, %c0_i32_0 : i32, i32
  }
  func.func @transform_7(%arg0: i32, %arg1: i32) -> (i32, i32, i32) {
    %c0_i32 = arith.constant 0 : i32
    %c0_i32_0 = arith.constant 0 : i32
    %c0_i32_1 = arith.constant 0 : i32
    %c0_i32_2 = arith.constant 0 : i32
    return %c0_i32, %c0_i32_0, %c0_i32_1 : i32, i32, i32
  }
  func.func @transform_8(%arg0: i32, %arg1: i32) -> (i32, i32) {
    %c0_i32 = arith.constant 0 : i32
    %c0_i32_0 = arith.constant 0 : i32
    %c0_i32_1 = arith.constant 0 : i32
    return %c0_i32, %c0_i32_0 : i32, i32
  }
  func.func @transform_9(%arg0: i32, %arg1: i32) -> (i32, i32, i32) {
    %c0_i32 = arith.constant 0 : i32
    %c0_i32_0 = arith.constant 0 : i32
    return %arg0, %arg1, %c0_i32 : i32, i32, i32
  }
  func.func @transform_10(%arg0: i32, %arg1: i32) -> (i32, i32, i32, i32) {
    %c0_i32 = arith.constant 0 : i32
    %c0_i32_0 = arith.constant 0 : i32
    %c0_i32_1 = arith.constant 0 : i32
    return %c0_i32, %arg0, %arg1, %c0_i32_0 : i32, i32, i32, i32
  }
}

</mosaic_0001>

<bundles_post_ra>
// kernel: tpu_custom_call.1
= control target key start
LH: loop header
LB: loop body
LE: loop exit
PB: predicated region body
PF: predicated region fallthrough
CT: control target
= control target key end

     0   :  { %s2301_s0 = inlined_call_operand.hbm [shape: bf16[2,8,32], index: 0, kind: input, shape index: {}]   ;;  %s2302_s1 = inlined_call_operand.hbm [shape: bf16[2,8,32], index: 1, kind: input, shape index: {}]   ;;  %s2303_s2 = inlined_call_operand.hbm [shape: bf16[2,8,32], index: 2, kind: input, shape index: {}]   ;;  %s2304_s3 = inlined_call_operand.hbm [shape: f32[2,8,8], index: 3, kind: input, shape index: {}]   ;;  %s2305_s4 = inlined_call_operand.hbm [shape: bf16[32,32], index: 4, kind: input, shape index: {}]   ;;  %s2306_s5 = inlined_call_operand.hbm [shape: bf16[32,32], index: 5, kind: input, shape index: {}]   ;;  %s2307_s6 = inlined_call_operand.hbm [shape: bf16[32,32], index: 6, kind: input, shape index: {}]   ;;  %s2308_s7 = inlined_call_operand.hbm [shape: bf16[4,8,32], index: 7, kind: input, shape index: {}]   ;;  %s2309_s8 = inlined_call_operand.vmem [shape: f32[1,32], index: 8, kind: input, shape index: {}]   ;;  %s2310_s9 = inlined_call_operand.hbm [shape: f32[2,8,32], index: 9, kind: output, shape index: {0}]   ;;  %s2311_s10 = inlined_call_operand.hbm [shape: f32[4,2,8,8], index: 10, kind: output, shape index: {1}]  }
   0x1   :  { %2323 = sst [smem:[#allocation32_spill]] %s2301_s0 }
   0x2   :  { %2324 = sst [smem:[#allocation33_spill]] %s2302_s1 }
   0x3   :  { %2325 = sst [smem:[#allocation34_spill]] %s2305_s4 }
   0x4   :  { %2326 = sst [smem:[#allocation35_spill]] %s2306_s5 }
   0x5   :  { %2327 = sst [smem:[#allocation36_spill]] %s2309_s8 }
   0x6   :  { %2328 = sst [smem:[#allocation37_spill]] %s2310_s9 }
   0x7   :  { %2329 = sst [smem:[#allocation38_spill]] %s2311_s10 }
   0x8   :  { %16 = vsyncpa [#allocation3], 0 }
   0x9   :  { %18 = vsyncpa [#allocation3 + $0x1], 0 }
   0xa   :  { %19 = vsyncpa [#allocation6], 0 }
   0xb   :  { %21 = vsyncpa [#allocation6 + $0x1], 0 }
   0xc   :  { %22 = vsyncpa [#allocation9], 0 }
   0xd   :  { %24 = vsyncpa [#allocation9 + $0x1], 0 }
   0xe   :  { %25 = vsyncpa [#allocation12], 0 }
   0xf   :  { %26 = vsyncpa [#allocation15], 0 }
  0x10   :  { %27 = vsyncpa [#allocation4], 0 }
  0x11   :  { %29 = vsyncpa [#allocation4 + $0x1], 0 }
  0x12   :  { %30 = vsyncpa [#allocation18], 0 }
  0x13   :  { %32 = vsyncpa [#allocation18 + $0x1], 0  ;;  %s1961_s13 = smov 0   ;;  %s1963_s14 = smov 0  }
  0x14   :  { %s1965_s15 = smov 0   ;;  %s1967_s16 = smov 0  }
  0x15   :  { %s1969_s17 = smov 0   ;;  %s1971_s18 = smov 0  }
  0x16 LB: > { %2330 = sst [smem:[#allocation27_spill]] %s1872_s13  ;;  %s1992_s19 = sadd.s32 4294967295, %s1892_s18   ;;  %s1892_s18 = sphi %s1971_s18, %s38_s18   ;;  %s1888_s17 = sphi %s1969_s17, %s2359_s17   ;;  %s1884_s16 = sphi %s1967_s16, %s2358_s16   ;;  %s1880_s15 = sphi %s1965_s15, %s2354_s15   ;;  %s1876_s14 = sphi %s1963_s14, %s2357_s14   ;;  %s1872_s13 = sphi %s1961_s13, %s2356_s13  }
  0x17   : > { %2331 = sst [smem:[#allocation28_spill]] %s1880_s15  ;;  %s1290_s20 = sadd.s32 4294967294, %s1892_s18  }
  0x18   : > { %p72_p0 = scmp.ne.s32.totalorder %s1876_s14, %s1872_s13  ;;  %p73_p1 = scmp.eq.s32.totalorder %s1992_s19, 0 }
  0x19   : > { %p283_p2 = scmp.eq.s32.totalorder %s1992_s19, 1  ;;  %p289_p3 = scmp.eq.s32.totalorder %s1290_s20, 1 }
  0x1a   : > { %p2001_p4 = por %p73_p1, %p72_p0  ;;  %p1291_p5 = scmp.ge.s32.totalorder %s1892_s18, 1 }
  0x1b   : > { %p2006_p6 = por %p289_p3, %p72_p0  ;;  %p324_p7 = scmp.lt.s32.totalorder %s1892_s18, 3 }
  0x1c   : > { %s2335_s4 = sld [smem:[#allocation34_spill]]  ;;  %s1894_s27 = smov [#allocation10]  }
  0x1d   : > { %s2333_s22 = scalar_select %p2006_p6, 1, 0 }
  0x1e   : > { %p2014_p8 = pnand %p1291_p5, %p324_p7  ;;  %s337_s28 = sshll.u32 %s1894_s27, 4  ;;  %s338_s28 = int_to_ptr.vmem [resolvable:$true] %s337_s28 }
  0x1f   : > { %2334 = sst [smem:[#allocation29_spill]] %s2333_s22  ;;  %p1296_p11 = scmp.ge.s32.totalorder %s1892_s18, 2 }
  0x20   : > { %p1398_p9 = pneg %p2014_p8  ;;  %s2338_s5 = sld [smem:[#allocation35_spill]] }
  0x21   : > { %s2312_s20 = smov 64   ;;  %s2314_s23 = smov 4  }
  0x22   : > { %s335_s25 = sshll.u32 %s2335_s4, 4  ;;  %p2022_p10 = pnand %p1398_p9, %p73_p1  ;;  %s336_s25 = int_to_ptr.hbm [resolvable:$true] %s335_s25 }
  0x23   : > { %s1897_s24 = smov [#allocation11]   ;;  %s50_s30 = sadd.s32 1, %s1888_s17 }
  0x24   : > { %1401 = dma.hbm_to_vmem [thread:$0]  (!%p2022_p10), %s336_s25, 256, %s338_s28, [#allocation9], %s2312_s20, %s2312_s20, %s2314_s23  }
  0x25   : > { %s351_s27 = sshll.u32 %s1897_s24, 4  ;;  %s59_s11 = sadd.s32 1, %s1880_s15  ;;  %s352_s27 = int_to_ptr.vmem [resolvable:$true] %s351_s27 }
  0x26   : > { %s349_s12 = sshll.u32 %s2338_s5, 4  ;;  %p52_p12 = scmp.ge.s32.totalorder %s50_s30, 2  ;;  %s350_s12 = int_to_ptr.hbm [resolvable:$true] %s349_s12 }
  0x27   : > { %1404 = dma.hbm_to_vmem [thread:$0]  (!%p2022_p10), %s350_s12, 256, %s352_s27, [#allocation12], %s2312_s20, %s2312_s20, %s2314_s23  }
  0x28   : > { %p66_p13 = scmp.ne.s32.totalorder %s1880_s15, %s1876_s14  ;;  %p67_p0 = scmp.eq.s32.totalorder %s1892_s18, 0 }
  0x29   : > { %p1435_p3 = scmp.lt.s32.totalorder %s1892_s18, 2  ;;  %s2361_s30 = smov (%p52_p12, %s50_s30), 0 }
  0x2a   : > { %2339 = sst [smem:[#allocation30_spill]] %s2361_s30  ;;  %p68_p5 = por %p67_p0, %p66_p13 }
  0x2b   : > { %p2050_p7 = por %p283_p2, %p66_p13  ;;  %s54_s28 = ssub.s32 %s1888_s17, %s2361_s30 }
  0x2c   : > { %s2057_s12 = sand.u32 1, %s1880_s15   ;;  %p57_p9 = scmp.eq.s32.totalorder %s54_s28, 0 }
  0x2d   : > { %s2060_s24 = sshll.u32 %s2057_s12, 2  ;;  %s2063_s27 = sshll.u32 %s1888_s17, 2 }
  0x2e   : > { %p2065_p12 = pnand %p1435_p3, %p68_p5  ;;  %s2321_s4 = sand.u32 1, %s1892_s18  }
  0x2f   : > { %s2070_s23 = scalar_select %p57_p9, %s1880_s15, %s59_s11  }
  0x30   : > { %s2343_s1 = sld [smem:[#allocation33_spill]]  ;;  %s420_s28 = scalar_lea.vmem [#allocation5], %s2060_s24 }
  0x31   : > { %2342 = sst [smem:[#allocation31_spill]] %s2070_s23  ;;  %s428_s13 = sshll.u32 %s420_s28, 4  ;;  %s429_s13 = int_to_ptr.vmem [resolvable:$true] %s428_s13 }
  0x32   : > { %s2080_s9 = scalar_lea.sflag [#allocation6], %s2321_s4  ;;  %s363_s15 = sshll.u32 %s2307_s6, 4  ;;  %s364_s15 = int_to_ptr.hbm [resolvable:$true] %s363_s15 }
  0x33   : > { %s1898_s5 = smov [#allocation13]   ;;  %s2344_s4 = smov 4  }
  0x34   : > { %s365_s30 = sshll.u32 %s1898_s5, 4  ;;  %s2345_s10 = smov 64   ;;  %s366_s30 = int_to_ptr.vmem [resolvable:$true] %s365_s30 }
  0x35   : > { %1407 = dma.hbm_to_vmem [thread:$0]  (!%p2022_p10), %s364_s15, 256, %s366_s30, [#allocation12], %s2345_s10, %s2345_s10, %s2344_s4  }
  0x36   : > { %s424_s22 = scalar_lea.hbm %s2343_s1, %s2063_s27  ;;  %s377_s1 = sshll.u32 %s2308_s7, 4  ;;  %s378_s1 = int_to_ptr.hbm [resolvable:$true] %s377_s1 }
  0x37   : > { %s426_s8 = sshll.u32 %s424_s22, 4  ;;  %s2346_s0 = sld [smem:[#allocation32_spill]]  ;;  %s427_s8 = int_to_ptr.hbm [resolvable:$true] %s426_s8 }
  0x38   : > { %1417 = dma.hbm_to_vmem [thread:$0]  (!%p2065_p12), %s427_s8, 64, %s429_s13, %s2080_s9  }
  0x39   : > { %s1899_s8 = smov [#allocation14]   ;;  %s400_s22 = scalar_lea.vmem [#allocation2], %s2060_s24 }
  0x3a   : > { %s379_s13 = sshll.u32 %s1899_s8, 4  ;;  %s409_s28 = sshll.u32 %s400_s22, 4  ;;  %s380_s13 = int_to_ptr.vmem [resolvable:$true] %s379_s13  ;;  %s410_s28 = int_to_ptr.vmem [resolvable:$true] %s409_s28 }
  0x3b   : > { %1410 = dma.hbm_to_vmem [thread:$0]  (!%p2022_p10), %s378_s1, 256, %s380_s13, [#allocation15], %s2345_s10, %s2345_s10, %s2344_s4  }
  0x3c   : > { %s397_s30 = scalar_lea.sflag [#allocation3], %s2057_s12  ;;  %s443_s1 = scalar_lea.hbm %s2303_s2, %s2063_s27 }
  0x3d   : > { %s405_s5 = scalar_lea.hbm %s2346_s0, %s2063_s27  ;;  %s439_s4 = scalar_lea.vmem [#allocation7], %s2060_s24 }
  0x3e   : > { %s407_s15 = sshll.u32 %s405_s5, 4  ;;  %s447_s10 = sshll.u32 %s439_s4, 4  ;;  %s408_s15 = int_to_ptr.hbm [resolvable:$true] %s407_s15  ;;  %s448_s10 = int_to_ptr.vmem [resolvable:$true] %s447_s10 }
  0x3f   : > { %1414 = dma.hbm_to_vmem [thread:$0]  (!%p2065_p12), %s408_s15, 64, %s410_s28, %s397_s30  }
  0x40   : > { %s445_s13 = sshll.u32 %s443_s1, 4  ;;  %s1303_s23 = sshll.u32 %s2057_s12, 3  ;;  %s446_s13 = int_to_ptr.hbm [resolvable:$true] %s445_s13 }
  0x41   : > { %1420 = dma.hbm_to_vmem [thread:$0]  (!%p2065_p12), %s446_s13, 64, %s448_s10, %s2080_s9  }
  0x42   : > { %s1304_s11 = sshll.u32 %s1888_s17, 3  ;;  %s458_s28 = scalar_lea.vmem [#allocation8], %s1303_s23 }
  0x43   : > { %s463_s0 = scalar_lea.hbm %s2304_s3, %s1304_s11  ;;  %s467_s15 = sshll.u32 %s458_s28, 4  ;;  %s468_s15 = int_to_ptr.vmem [resolvable:$true] %s467_s15 }
  0x44   : > { %s465_s30 = sshll.u32 %s463_s0, 4  ;;  %s2347_s27 = sand.u32 1, %s1892_s18   ;;  %s466_s30 = int_to_ptr.hbm [resolvable:$true] %s465_s30 }
  0x45   : > { %s455_s29 = scalar_lea.sflag [#allocation9], %s2347_s27  ;;  %476 = sbr.rel (%p2014_p8) target bundleno = 1432 (0x598), region = 56 }
  0x46   : > { %1423 = dma.hbm_to_vmem [thread:$0]  (!%p2065_p12), %s466_s30, 128, %s468_s15, %s455_s29  }
  0x47   : > { %s2129_s9 = sand.u32 (!%p2014_p8), 1, %s1876_s14  }
  0x48   : > { %s2132_s12 = sshll.u32 (!%p2014_p8), %s2129_s9, 2  ;;  %s479_s24 = scalar_lea.sflag (!%p2014_p8), [#allocation3], %s2129_s9 }
  0x49   : > { %s482_s0 = scalar_lea.vmem (!%p2014_p8), [#allocation2], %s2132_s12 }
  0x4a   : > { %1839 = dma.done.wait (%p2001_p4), %s479_s24, 64  }
  0x4b   : > { %1841 = vsyncadd (%p2001_p4), %s479_s24, 4294967232  ;;  %s488_s26 = sand.u32 1, %s1992_s19   ;;  %s492_s8 = scalar_lea.vmem [#allocation5], %s2132_s12 }
  0x4c   : > { %s489_s20 = scalar_lea.sflag [#allocation6], %s488_s26 }
  0x4d   : > { %1843 = dma.done.wait (%p2001_p4), %s489_s20, 128  }
  0x4e   : > { %1845 = vsyncadd (%p2001_p4), %s489_s20, 4294967168  ;;  %s1309_s1 = sshll.u32 %s2129_s9, 3  ;;  %s502_s4 = scalar_lea.vmem [#allocation7], %s2132_s12 }
  0x4f   : > { %s509_s10 = scalar_lea.sflag [#allocation9], %s488_s26  ;;  %s2150_s13 = scalar_lea.vmem [#allocation8], %s1309_s1 }
  0x50   : > { %1847 = dma.done.wait (%p2001_p4), %s509_s10, 128  }
  0x51   : > { %1849 = vsyncadd (%p2001_p4), %s509_s10, 4294967168 }
  0x52   : > { %1851 = dma.done.wait (%p73_p1), [#allocation9], 256  }
  0x53   : > { %1853 = vsyncadd (%p73_p1), [#allocation9], 4294967040 }
  0x54   : > { %1855 = dma.done.wait (%p73_p1), [#allocation12], 512  }
  0x55   : > { %1857 = vsyncadd (%p73_p1), [#allocation12], 4294966784 }
  0x56   : > { %1859 = dma.done.wait (%p73_p1), [#allocation15], 256  }
  0x57   : > { %1861 = vsyncadd (%p73_p1), [#allocation15], 4294967040  ;;  %v1365_v0 = vld [vmem:[#allocation10 + $0x8] sm:$0xff]  ;;  %v1367_v1 = vld [vmem:[#allocation11 + $0x8] sm:$0xff]  ;;  %vm610_vm0 = vcmask 261120   ;;  %vm696_vm1 = vcmask 64512  }
  0x58   : > { %620 = vmatpush.bf16.msra.mxu0 %v1365_v0  ;;  %653 = vmatpush.bf16.msra.mxu1 %v1367_v1  ;;  %v1364_v2 = vld [vmem:[#allocation10] sm:$0xff]  ;;  %v1366_v3 = vld [vmem:[#allocation11] sm:$0xff]  ;;  %v591_v4 = vld [vmem:[%s482_s0] sm:$0xf]  ;;  %s1900_s19 = smov 112   ;;  %s1901_s21 = smov 120  }
  0x59   : > { %v592_v5 = vld [vmem:[%s492_s8] sm:$0xf]  ;;  %s1902_s23 = smov 104   ;;  %v1369_v17 = vld [vmem:[#allocation13 + $0x8] sm:$0xff]  ;;  %v2184_v25 = vld [vmem:[%s2150_s13] sm:$0xff]  ;;  %vm733_vm3 = vcmask 1043456  }
  0x5a   : > { %686 = vmatpush.bf16.msra.mxu2 %v1369_v17  ;;  %v1368_v19 = vld [vmem:[#allocation13] sm:$0xff]  ;;  %v593_v23 = vld [vmem:[%s502_s4] sm:$0xf]  ;;  %vm695_vm2 = vcmp.gt.f32.partialorder %v2184_v25, 0.0  ;;  %v751_v44 = vld [vmem:[#allocation14] sm:$0xf] }
  0x5b   : > { %v846_v45 = vsel %vm733_vm3, %v751_v44, 0  ;;  %s1315_s11 = sshll.u32 %s2129_s9, 5  ;;  %s1360_s22 = sshll.u32 %s1884_s16, 3 }
  0x5c   : > { %621 = vmatpush.bf16.msra.mxu0 %v1364_v2  ;;  %654 = vmatpush.bf16.msra.mxu1 %v1366_v3  ;;  %s2199_s5 = scalar_lea.vmem [#allocation17], %s1315_s11  ;;  %s2348_s27 = sld [smem:[#allocation38_spill]] }
  0x5d   : > { %s1064_s28 = sshll.u32 %s2199_s5, 4  ;;  %s1037_s24 = scalar_lea.sflag [#allocation18], %s2129_s9  ;;  %s1065_s28 = int_to_ptr.vmem [resolvable:$true] %s1064_s28 }
  0x5e   : > { %687 = vmatpush.bf16.msra.mxu2 %v1368_v19 }
  0x5f   : > { %1324 = vmatmul.msk.bf16.vlgmr.msra.gmra.mxu0 %vm610_vm0, %v591_v4  ;;  %1333 = vmatmul.msk.bf16.vlgmr.msra.gmra.mxu1 %vm610_vm0, %v592_v5 }
  0x61   : > { %1342 = vmatmul.msk.bf16.vlgmr.msra.gmra.mxu2 %vm610_vm0, %v593_v23 }
  0x62   : > { %s1063_s29 = scalar_lea.hbm %s2348_s27, %s1360_s22  ;;  %s1778_s16 = scalar_lea.hbm %s2348_s27, 64 }
  0x63   : > { %s1066_s12 = sshll.u32 %s1063_s29, 4  ;;  %s1067_s12 = int_to_ptr.hbm [resolvable:$true] %s1066_s12 }
  0x64   : > { %s1772_s0 = sshra.s32 %s1067_s12, 4  ;;  %s1773_s0 = int_to_ptr.hbm [resolvable:$true] %s1772_s0 }
  0x65   : > { %s1774_s26 = scalar_lea.hbm %s1773_s0, 32  ;;  %p1779_p8 = scmp.lt.s32.totalorder %s1773_s0, %s2348_s27 }
  0x66   : > { %p1775_p1 = scmp.ne.s32.totalorder %s1773_s0, %s1774_s26  ;;  %p1780_p10 = scmp.lt.s32.totalorder %s1778_s16, %s1774_s26 }
  0x68   : > { %p1776_p2 = pnand %p1775_p1, %p2050_p7  ;;  %p1781_p13 = por %p1780_p10, %p1779_p8 }
  0x6a   : > { %p1777_p4 = pneg %p1776_p2 }
  0x6c   : > { %p1782_p0 = pnand %p1781_p13, %p1777_p4 }
  0xdc   : > { %v623_v6 = vpop.f32.mrf.mxu0  ;;  %v656_v7 = vpop.f32.mrf.mxu1 }
  0xdd   : > { %v660_v8 = vpack.c.bf16 %v656_v7, %v656_v7  ;;  %v627_v9 = vpack.c.bf16 %v623_v6, %v623_v6 }
  0xdf   : > { %v758_v10 = vunpack.c.l.b16 %v660_v8  ;;  %v701_v11 = vsel %vm696_vm1, %v660_v8, 0  ;;  %v753_v13 = vunpack.c.l.b16 %v627_v9 }
  0xe0   : > { %710 = vmatpush.bf16.xpose.msra.mxu3 %v701_v11 }
  0xe1   : > { %v759_v12 = vpack.c.b16 %v758_v10, %v758_v10  ;;  %v754_v16 = vpack.c.b16 %v753_v13, %v753_v13 }
  0xe3   : > { %863 = vrot.lane.b32.xlu2 %v759_v12, %s1900_s19  ;;  %760 = vrot.lane.b32.xlu1 %v759_v12, %s1901_s21 }
  0xe4   : > { %v625_v14 = vpop.f32.mrf.mxu0  ;;  %v658_v15 = vpop.f32.mrf.mxu1 }
  0xe5   : > { %v689_v39 = vpop.f32.mrf.mxu2 }
  0xe6   : > { %v693_v41 = vpack.c.bf16 %v689_v39, %v689_v39 }
  0xe7   : > { %1343 = vmatmul.msk.bf16.vlgmr.msra.gmra.mxu3 %vm696_vm1, %v627_v9  ;;  %v822_v9 = vld [vmem:[#allocation14 + $0x4] sm:$0xf] }
  0xe8   : > { %v735_v42 = vsel %vm733_vm3, %v693_v41, 0  ;;  %v797_v56 = vunpack.c.l.b16 %v693_v41  ;;  %v827_v10 = vsel %vm733_vm3, %v822_v9, 0 }
  0xe9   : > { %744 = vmatpush.bf16.msrb.mxu0 %v735_v42  ;;  %836 = vmatpush.bf16.msrb.mxu3 %v827_v10 }
  0xea   : > { %v2205_v58 = vpack.c.b16 %v797_v56, %v797_v56 }
  0xeb   : > { %945 = vrot.lane.b32.xlu2 %v759_v12, %s1902_s23  ;;  %755 = vrot.lane.b32.xlu1 %v754_v16, %s1901_s21 }
  0xed   : > { %v691_v40 = vpop.f32.mrf.mxu2  ;;  %855 = vmatpush.bf16.msra.mxu0 %v846_v45 }
  0xf3   : > { %943 = vrot.lane.b32.xlu1 %v754_v16, %s1902_s23 }
 0x13d   : > { %v864_v18 = vpop.permute.xlu2 %863 }
 0x13e   : > { %v869_v22 = vsel %vm696_vm1, %v864_v18, 0 }
 0x145   : > { %v946_v43 = vpop.permute.xlu2 %945 }
 0x146   : > { %v951_v55 = vsel %vm696_vm1, %v946_v43, 0 }
 0x155   : > { %v761_v20 = vpop.permute.xlu1 %760 }
 0x156   : > { %v766_v21 = vsel %vm696_vm1, %v761_v20, 0 }
 0x157   : > { %775 = vmatpush.bf16.xpose.msrb.mxu1 %v766_v21 }
 0x15d   : > { %v756_v24 = vpop.permute.xlu1 %755 }
 0x15e   : > { %1345 = vmatmul.msk.bf16.vlgmr.msrb.gmra.mxu1 %vm696_vm1, %v756_v24 }
 0x15f   : > { %878 = vmatpush.bf16.xpose.msra.mxu1 %v869_v22 }
 0x165   : > { %v944_v8 = vpop.permute.xlu1 %943 }
 0x16a   : > { %v712_v26 = vpop.f32.mrf.mxu3 }
 0x16b   : > { %v716_v27 = vsel %vm695_vm2, -1e+18, %v712_v26 }
 0x16c   : > { %v717_v28 = vsel %vm696_vm1, %v716_v27, -inf }
 0x16d   : > { %718 = vmax.xlane.f32.xlu0 %v717_v28 }
 0x172   : > { %v714_v29 = vpop.f32.mrf.mxu3 }
 0x1db   : > { %v777_v30 = vpop.f32.mrf.mxu1 }
 0x1dc   : > { %v781_v31 = vsel %vm695_vm2, -1e+18, %v777_v30 }
 0x1dd   : > { %v782_v32 = vsel %vm696_vm1, %v781_v31, -inf }
 0x1de   : > { %783 = vmax.xlane.f32.xlu2 %v782_v32 }
 0x1e0   : > { %v719_v33 = vpop.xlane.xlu0 %718 }
 0x1e1   : > { %v720_v34 = vsub.f32 %v716_v27, %v719_v33 }
 0x1e3   : > { %v721_v35 = vmul.f32 1.442695, %v720_v34  ;;  %v779_v36 = vpop.f32.mrf.mxu1 }
 0x1e5   : > { %1502 = vpow2.f32 %v721_v35 }
 0x1eb   : > { %v1503_v37 = vpop.eup %1502 }
 0x1ec   : > { %v723_v38 = vsel %vm696_vm1, %v1503_v37, 0.0 }
 0x1ed   : > { %724 = vadd.xlane.f32.xlu0 %v723_v38  ;;  %v922_v38 = vld [vmem:[#allocation14 + $0x8] sm:$0xf] }
 0x1ee   : > { %v927_v39 = vsel %vm733_vm3, %v922_v38, 0 }
 0x1ef   : > { %936 = vmatpush.bf16.msra.mxu3 %v927_v39 }
 0x201   : > { %861 = vrot.lane.b32.xlu0 %v754_v16, %s1900_s19 }
 0x251   : > { %v784_v46 = vpop.xlane.xlu2 %783 }
 0x252   : > { %v785_v47 = vsub.f32 %v781_v31, %v784_v46 }
 0x254   : > { %v786_v48 = vmul.f32 1.442695, %v785_v47 }
 0x256   : > { %1504 = vpow2.f32 %v786_v48 }
 0x25c   : > { %v1505_v49 = vpop.eup %1504 }
 0x25d   : > { %v788_v50 = vsel %vm696_vm1, %v1505_v49, 0.0 }
 0x25e   : > { %789 = vadd.xlane.f32.xlu2 %v788_v50 }
 0x260   : > { %v725_v51 = vpop.xlane.xlu0 %724 }
 0x261   : > { %1506 = vrcp.f32 %v725_v51 }
 0x267   : > { %v1507_v52 = vpop.eup %1506 }
 0x268   : > { %v727_v53 = vmul.f32 %v1507_v52, %v1503_v37 }
 0x26a   : > { %728 = vst.msk [vmem:[%s2199_s5] sm:$0xff] %vm696_vm1, %v727_v53  ;;  %v729_v54 = vpack.c.bf16 %v727_v53, %v727_v53 }
 0x26c   : > { %1344 = vmatmul.msk.bf16.vlgmr.msrb.gmra.mxu0 %vm696_vm1, %v729_v54 }
 0x26d   : > { %960 = vmatpush.bf16.xpose.msrb.mxu0 %v951_v55 }
 0x273   : > { %v862_v57 = vpop.permute.xlu0 %861 }
 0x274   : > { %1350 = vmatmul.msk.bf16.vlgmr.msra.gmra.mxu1 %vm696_vm1, %v862_v57 }
 0x276   : > { %799 = vrot.lane.b32.xlu2 %v2205_v58, %s1901_s21 }
 0x2d1   : > { %v790_v59 = vpop.xlane.xlu2 %789 }
 0x2d2   : > { %1508 = vrcp.f32 %v790_v59 }
 0x2d8   : > { %v1509_v60 = vpop.eup %1508 }
 0x2d9   : > { %v792_v61 = vmul.f32 %v1509_v60, %v1505_v49  ;;  %v800_v62 = vpop.permute.xlu2 %799  ;;  %v1004_v49 = vld [vmem:[#allocation14 + $0xc] sm:$0xf] }
 0x2da   : > { %v805_v63 = vsel %vm733_vm3, %v800_v62, 0  ;;  %v1009_v50 = vsel %vm733_vm3, %v1004_v49, 0 }
 0x2db   : > { %1346 = vst.msk [vmem:[%s2199_s5 + $0x8] sm:$0xff] %vm696_vm1, %v792_v61  ;;  %814 = vmatpush.bf16.msrb.mxu2 %v805_v63  ;;  %v795_v0 = vpack.c.bf16 %v792_v61, %v792_v61 }
 0x2de   : > { %1347 = vmatmul.msk.bf16.vlgmr.msrb.gmra.mxu2 %vm696_vm1, %v795_v0 }
 0x2e9   : > { %v746_v1 = vpop.f32.mrf.mxu0 }
 0x2ea   : > { %v750_v2 = vpack.c.bf16 %v746_v1, %v746_v1 }
 0x2ec   : > { %1349 = vmatmul.msk.bf16.vlgmr.msra.gmra.mxu0 %vm696_vm1, %v750_v2 }
 0x2f1   : > { %v748_v3 = vpop.f32.mrf.mxu0  ;;  %v880_v4 = vpop.f32.mrf.mxu1 }
 0x2f2   : > { %v884_v5 = vsel %vm695_vm2, -1e+18, %v880_v4 }
 0x2f3   : > { %v885_v6 = vsel %vm696_vm1, %v884_v5, -inf }
 0x2f4   : > { %886 = vmax.xlane.f32.xlu1 %v885_v6 }
 0x2f9   : > { %v882_v7 = vpop.f32.mrf.mxu1 }
 0x2fc   : > { %1354 = vmatmul.msk.bf16.vlgmr.msrb.gmra.mxu0 %vm696_vm1, %v944_v8 }
 0x361   : > { %v816_v11 = vpop.f32.mrf.mxu2 }
 0x362   : > { %v820_v12 = vpack.c.bf16 %v816_v11, %v816_v11 }
 0x364   : > { %1348 = vmatmul.msk.bf16.vlgmr.msrb.gmra.mxu3 %vm696_vm1, %v820_v12 }
 0x367   : > { %v887_v13 = vpop.xlane.xlu1 %886 }
 0x368   : > { %v888_v14 = vsub.f32 %v884_v5, %v887_v13 }
 0x369   : > { %v818_v15 = vpop.f32.mrf.mxu2  ;;  %v857_v16 = vpop.f32.mrf.mxu0 }
 0x36a   : > { %v889_v17 = vmul.f32 1.442695, %v888_v14 }
 0x36c   : > { %1510 = vpow2.f32 %v889_v17 }
 0x371   : > { %v859_v18 = vpop.f32.mrf.mxu0 }
 0x372   : > { %v1511_v19 = vpop.eup %1510 }
 0x373   : > { %v891_v20 = vsel %vm696_vm1, %v1511_v19, 0.0 }
 0x374   : > { %892 = vadd.xlane.f32.xlu1 %v891_v20 }
 0x379   : > { %v962_v21 = vpop.f32.mrf.mxu0 }
 0x37a   : > { %v966_v22 = vsel %vm695_vm2, -1e+18, %v962_v21 }
 0x37b   : > { %v967_v23 = vsel %vm696_vm1, %v966_v22, -inf }
 0x37c   : > { %968 = vmax.xlane.f32.xlu0 %v967_v23 }
 0x381   : > { %v964_v24 = vpop.f32.mrf.mxu0 }
 0x390   : > { %899 = vrot.lane.b32.xlu0 %v2205_v58, %s1900_s19 }
 0x3e7   : > { %v893_v26 = vpop.xlane.xlu1 %892  ;;  %v838_v27 = vpop.f32.mrf.mxu3 }
 0x3e8   : > { %1512 = vrcp.f32 %v893_v26  ;;  %v858_v53 = vadd.f32 %v857_v16, %v838_v27 }
 0x3ee   : > { %v1513_v28 = vpop.eup %1512 }
 0x3ef   : > { %v895_v29 = vmul.f32 %v1513_v28, %v1511_v19  ;;  %v840_v30 = vpop.f32.mrf.mxu3  ;;  %v969_v31 = vpop.xlane.xlu0 %968 }
 0x3f0   : > { %v970_v32 = vsub.f32 %v966_v22, %v969_v31 }
 0x3f1   : > { %1351 = vst.msk [vmem:[%s2199_s5 + $0x10] sm:$0xff] %vm696_vm1, %v895_v29  ;;  %v898_v37 = vpack.c.bf16 %v895_v29, %v895_v29 }
 0x3f2   : > { %v971_v33 = vmul.f32 1.442695, %v970_v32 }
 0x3f4   : > { %1514 = vpow2.f32 %v971_v33 }
 0x3fa   : > { %v1515_v25 = vpop.eup %1514 }
 0x3fb   : > { %v973_v34 = vsel %vm696_vm1, %v1515_v25, 0.0 }
 0x3fc   : > { %974 = vadd.xlane.f32.xlu1 %v973_v34 }
 0x402   : > { %v900_v35 = vpop.permute.xlu0 %899 }
 0x403   : > { %v905_v36 = vsel %vm733_vm3, %v900_v35, 0 }
 0x404   : > { %914 = vmatpush.bf16.msra.mxu2 %v905_v36 }
 0x407   : > { %1352 = vmatmul.msk.bf16.vlgmr.msra.gmra.mxu2 %vm696_vm1, %v898_v37 }
 0x408   : > { %1018 = vmatpush.bf16.msrb.mxu2 %v1009_v50 }
 0x415   : > { %981 = vrot.lane.b32.xlu1 %v2205_v58, %s1902_s23 }
 0x46f   : > { %v975_v40 = vpop.xlane.xlu1 %974 }
 0x470   : > { %1516 = vrcp.f32 %v975_v40 }
 0x476   : > { %v1517_v41 = vpop.eup %1516 }
 0x477   : > { %v977_v42 = vmul.f32 %v1517_v41, %v1515_v25 }
 0x479   : > { %1355 = vst.msk [vmem:[%s2199_s5 + $0x18] sm:$0xff] %vm696_vm1, %v977_v42  ;;  %v980_v45 = vpack.c.bf16 %v977_v42, %v977_v42 }
 0x487   : > { %v982_v43 = vpop.permute.xlu1 %981 }
 0x488   : > { %v987_v44 = vsel %vm733_vm3, %v982_v43, 0 }
 0x489   : > { %996 = vmatpush.bf16.msrb.mxu1 %v987_v44 }
 0x48a   : > { %v916_v46 = vpop.f32.mrf.mxu2 }
 0x48b   : > { %v920_v47 = vpack.c.bf16 %v916_v46, %v916_v46 }
 0x48c   : > { %1356 = vmatmul.msk.bf16.vlgmr.msrb.gmra.mxu1 %vm696_vm1, %v980_v45 }
 0x48d   : > { %1353 = vmatmul.msk.bf16.vlgmr.msra.gmra.mxu3 %vm696_vm1, %v920_v47 }
 0x492   : > { %v918_v48 = vpop.f32.mrf.mxu2 }
 0x509   : > { %v998_v51 = vpop.f32.mrf.mxu1 }
 0x50a   : > { %v1002_v52 = vpack.c.bf16 %v998_v51, %v998_v51 }
 0x50c   : > { %1357 = vmatmul.msk.bf16.vlgmr.msrb.gmra.mxu2 %vm696_vm1, %v1002_v52 }
 0x510   : > { %v938_v54 = vpop.f32.mrf.mxu3 }
 0x511   : > { %v942_v55 = vadd.f32 %v938_v54, %v858_v53  ;;  %v1000_v56 = vpop.f32.mrf.mxu1 }
 0x518   : > { %v940_v57 = vpop.f32.mrf.mxu3 }
 0x519   : > { %1785 = shalt.err (!%p1782_p0)
}
 0x51a   : > { %s1903_s13 = smov 128   ;;  %s1904_s19 = smov 256  }
 0x51b   : > { %s1905_s21 = smov 8   ;;  %s2349_s5 = sld [smem:[#allocation37_spill]] }
 0x51c   : > { %1395 = dma.vmem_to_hbm [thread:$0]  (%p2050_p7), %s1065_s28, 512, %s1067_s12, %s1037_s24, %s1903_s13, %s1904_s19, %s1905_s21  }
 0x51d   : > { %s2350_s20 = sld [smem:[#allocation36_spill]]  ;;  %s582_s0 = scalar_lea.vmem [#allocation16], %s1309_s1 }
 0x51e   : > { %s1050_s26 = sshll.u32 %s582_s0, 4  ;;  %s1032_s28 = scalar_lea.sflag [#allocation4], %s2129_s9  ;;  %s1051_s26 = int_to_ptr.vmem [resolvable:$true] %s1050_s26 }
 0x521   : > { %s1048_s15 = scalar_lea.hbm %s2349_s5, %s1360_s22  ;;  %s1806_s1 = scalar_lea.hbm %s2349_s5, 16 }
 0x522   : > { %s1052_s8 = sshll.u32 %s1048_s15, 4  ;;  %s1053_s8 = int_to_ptr.hbm [resolvable:$true] %s1052_s8 }
 0x523   : > { %v1501_v58 = vld [vmem:[%s2350_s20] ss:$0 sm:$0xff]  ;;  %s1800_s12 = sshra.s32 %s1053_s8, 4  ;;  %s1801_s12 = int_to_ptr.hbm [resolvable:$true] %s1800_s12 }
 0x524   : > { %s1802_s22 = scalar_lea.hbm %s1801_s12, 8  ;;  %p1807_p12 = scmp.lt.s32.totalorder %s1801_s12, %s2349_s5 }
 0x525   : > { %p1803_p3 = scmp.ne.s32.totalorder %s1801_s12, %s1802_s22  ;;  %p1808_p1 = scmp.lt.s32.totalorder %s1806_s1, %s1802_s22 }
 0x527   : > { %p1804_p5 = pnand %p1803_p3, %p2050_p7  ;;  %p1809_p2 = por %p1808_p1, %p1807_p12 }
 0x529   : > { %p1805_p9 = pneg %p1804_p5 }
 0x52b   : > { %p1810_p4 = pnand %p1809_p2, %p1805_p9 }
 0x58f   : > { %v1020_v59 = vpop.f32.mrf.mxu2 }
 0x590   : > { %v1024_v60 = vadd.f32 %v1020_v59, %v942_v55 }
 0x592   : > { %v1029_v61 = vadd.f32 %v1501_v58, %v1024_v60 }
 0x594   : > { %1030 = vst.msk [vmem:[%s582_s0] sm:$0xff] %vm610_vm0, %v1029_v61 }
 0x595   : > { %1813 = shalt.err (!%p1810_p4)
}
 0x596   : > { %1394 = dma.vmem_to_hbm [thread:$0]  (%p2050_p7), %s1051_s26, 128, %s1053_s8, %s1032_s28  }
 0x597   : > { %v1022_v62 = vpop.f32.mrf.mxu2 }
 0x598 PF: > { %s2351_s9 = sld [smem:[#allocation27_spill]]  ;;  %p1425_p8 = pnand %p1296_p11, %p2006_p6 }
 0x59a   : > { %p1426_p10 = pneg %p1425_p8 }
 0x59e   : > { %s1081_s19 = sand.u32 1, %s2351_s9  }
 0x59f   : > { %s1082_s21 = scalar_lea.sflag [#allocation4], %s1081_s19 }
 0x5a0   : > { %1863 = dma.done.wait (%p1426_p10), %s1082_s21, 128  }
 0x5a1   : > { %1865 = vsyncadd (%p1426_p10), %s1082_s21, 4294967168  ;;  %s1092_s23 = scalar_lea.sflag [#allocation18], %s1081_s19 }
 0x5a2   : > { %1867 = dma.done.wait (%p1426_p10), %s1092_s23, 512  }
 0x5a3   : > { %1869 = vsyncadd (%p1426_p10), %s1092_s23, 4294966784  ;;  %s38_s18 = sadd.s32 1, %s1892_s18   ;;  %s2353_s25 = sld [smem:[#allocation28_spill]] }
 0x5a4   : > { %p35_p13 = scmp.ge.s32.totalorder %s38_s18, 4   ;;  %s2354_s15 = sld [smem:[#allocation31_spill]] }
 0x5a5   : > { %s2355_s11 = sld [smem:[#allocation30_spill]]  ;;  %s2356_s13 = smov %s1876_s14 }
 0x5a6   : > { %s2358_s16 = smov %s1888_s17 }
 0x5a7   :  { %37 = sbr.rel (!%p35_p13) target bundleno = 22 (0x16), region = 177 }
 0x5a9   : > { %s2357_s14 = smov %s2353_s25 }
 0x5ab   : > { %s2359_s17 = smov %s2355_s11 }
 0x5ac   :  { %1098 = vsyncpa [#allocation3], 1 }
 0x5ad   :  { %1100 = vsyncpa [#allocation3 + $0x1], 1 }
 0x5ae   :  { %1101 = vsyncpa [#allocation6], 1 }
 0x5af   :  { %1103 = vsyncpa [#allocation6 + $0x1], 1 }
 0x5b0   :  { %1104 = vsyncpa [#allocation9], 1 }
 0x5b1   :  { %1106 = vsyncpa [#allocation9 + $0x1], 1 }
 0x5b2   :  { %1107 = vsyncpa [#allocation12], 1 }
 0x5b3   :  { %1108 = vsyncpa [#allocation15], 1 }
 0x5b4   :  { %1109 = vsyncpa [#allocation4], 1 }
 0x5b5   :  { %1111 = vsyncpa [#allocation4 + $0x1], 1 }
 0x5b6   :  { %1112 = vsyncpa [#allocation18], 1 }
 0x5b7   :  { %1114 = vsyncpa [#allocation18 + $0x1], 1 }

</bundles_post_ra>
